<compile_context>
chip_gen: v7x
topology: tpu7x:2x2x1
jax: 0.10.0
libtpu: 0.0.40
codegen_flags: <defaults>
</compile_context>

<pallas_src>
import functools

import jax
import jax.numpy as jnp
from jax.experimental import pallas as pl
from jax.experimental.pallas import tpu as pltpu

_LANE = 128
_SUBLANE = 8


def _round_up(x, m):
    return ((x + m - 1) // m) * m


def _pad2(a, rows, cols):
    return jnp.pad(a, ((0, rows - a.shape[0]), (0, cols - a.shape[1])))


def _mlp_kernel(x_ref, w1_ref, b1_ref, w2_ref, b2_ref, w3_ref, b3_ref, o_ref):
    x = x_ref[...]
    if x.dtype != w1_ref.dtype:
        # In-kernel cast (VPU, effectively free); keeps HBM I/O in f32.
        x = x.astype(w1_ref.dtype)

    # fc1 + ReLU (f32 accumulation on the MXU, f32 epilogue on the VPU)
    h1 = jnp.dot(x, w1_ref[...], preferred_element_type=jnp.float32) + b1_ref[...]
    h1 = jnp.maximum(h1, 0.0)

    # fc2 + ReLU
    if h1.dtype != w2_ref.dtype:
        h1 = h1.astype(w2_ref.dtype)
    h2 = jnp.dot(h1, w2_ref[...], preferred_element_type=jnp.float32) + b2_ref[...]
    h2 = jnp.maximum(h2, 0.0)

    # fc3 + final ReLU (eval mode: no exploration noise)
    if h2.dtype != w3_ref.dtype:
        h2 = h2.astype(w3_ref.dtype)
    y = jnp.dot(h2, w3_ref[...], preferred_element_type=jnp.float32) + b3_ref[...]
    o_ref[...] = jnp.maximum(y, 0.0).astype(o_ref.dtype)


def prepare_params(params, compute_dtype=jnp.float32):
    """Pad / cast weights ONCE (outside the per-step forward; cache the result).

    Only the hidden dim is padded to a lane multiple (128).  Input and output
    feature dims stay at their logical width so activation HBM traffic is not
    inflated.  Biases always stay f32.
    """
    in_size = params["w1"].shape[0]
    hidden = params["w1"].shape[1]
    out_size = params["w3"].shape[1]
    hid_p = _round_up(hidden, _LANE)

    w1 = _pad2(params["w1"], in_size, hid_p)
    b1 = _pad2(params["b1"], 1, hid_p)
    w2 = _pad2(params["w2"], hid_p, hid_p)
    b2 = _pad2(params["b2"], 1, hid_p)
    w3 = _pad2(params["w3"], hid_p, out_size)
    b3 = params["b3"]

    if compute_dtype != jnp.float32:
        w1 = w1.astype(compute_dtype)
        w2 = w2.astype(compute_dtype)
        w3 = w3.astype(compute_dtype)

    return {"w1": w1, "b1": b1, "w2": w2, "b2": b2, "w3": w3, "b3": b3}


@functools.partial(jax.jit, static_argnames=("tile_b",))
def hybrid_guide_network(state, padded_params, *, tile_b=1024):
    """state: (B, input_size) f32. padded_params: output of prepare_params()."""
    w1 = padded_params["w1"]
    b1 = padded_params["b1"]
    w2 = padded_params["w2"]
    b2 = padded_params["b2"]
    w3 = padded_params["w3"]
    b3 = padded_params["b3"]

    B, in_size = state.shape
    hid_p = w1.shape[1]
    out_size = w3.shape[1]

    # Batch tiling: no batch padding (grid = cdiv), at least 2 grid steps when
    # the batch allows it so the parallel axis shards across both v7x TCs.
    if B <= _SUBLANE:
        tb = B                      # full-dim block; legal regardless of B % 8
    else:
        tb = min(tile_b, _round_up(pl.cdiv(B, 2), _SUBLANE))
        tb = max(tb, _SUBLANE)
    grid = (pl.cdiv(B, tb),)

    batched = lambda i: (i, 0)
    resident = lambda i: (0, 0)     # weights/biases pinned in VMEM across the grid

    out = pl.pallas_call(
        _mlp_kernel,
        out_shape=jax.ShapeDtypeStruct((B, out_size), jnp.float32),
        grid=grid,
        in_specs=[
            pl.BlockSpec((tb, in_size), batched),        # logical-width x, no pad
            pl.BlockSpec((in_size, hid_p), resident),
            pl.BlockSpec((1, hid_p), resident),
            pl.BlockSpec((hid_p, hid_p), resident),
            pl.BlockSpec((1, hid_p), resident),
            pl.BlockSpec((hid_p, out_size), resident),
            pl.BlockSpec((1, out_size), resident),
        ],
        out_specs=pl.BlockSpec((tb, out_size), batched),  # logical-width output
        compiler_params=pltpu.CompilerParams(
            dimension_semantics=("parallel",),
        ),
    )(state, w1, b1, w2, b2, w3, b3)

    return out


def init_params(key, input_size, hidden_size, output_size):
    """Deterministic init mimicking nn.Linear's U(-1/sqrt(fan_in), 1/sqrt(fan_in)).

    Weights are stored transposed: (in_features, out_features).
    Biases are stored as (1, out_features).
    """
    ks = jax.random.split(key, 6)

    def lin(kw, kb, fan_in, fan_out):
        bound = 1.0 / jnp.sqrt(jnp.float32(fan_in))
        w = jax.random.uniform(kw, (fan_in, fan_out), jnp.float32, -bound, bound)
        b = jax.random.uniform(kb, (1, fan_out), jnp.float32, -bound, bound)
        return w, b

    w1, b1 = lin(ks[0], ks[1], input_size, hidden_size)
    w2, b2 = lin(ks[2], ks[3], hidden_size, hidden_size)
    w3, b3 = lin(ks[4], ks[5], hidden_size, output_size)
    return {"w1": w1, "b1": b1, "w2": w2, "b2": b2, "w3": w3, "b3": b3}


if __name__ == "__main__":
    key = jax.random.PRNGKey(0)
    k_params, k_state = jax.random.split(key)

    batch, input_size, hidden_size, output_size = 8, 32, 32, 16
    params = init_params(k_params, input_size, hidden_size, output_size)
    state = jax.random.normal(k_state, (batch, input_size), dtype=jnp.float32)

    # Pad/cast weights once, outside the per-step forward.
    padded_params = jax.tree_util.tree_map(
        jax.block_until_ready, prepare_params(params)
    )

    out = hybrid_guide_network(state, padded_params)
    out = jax.block_until_ready(out)

    # Sanity check against a plain-JAX reference of the same forward (eval mode).
    h1 = jnp.maximum(state @ params["w1"] + params["b1"], 0.0)
    h2 = jnp.maximum(h1 @ params["w2"] + params["b2"], 0.0)
    ref = jnp.maximum(h2 @ params["w3"] + params["b3"], 0.0)
    assert out.shape == (batch, output_size)
    assert jnp.allclose(out, ref, atol=1e-5, rtol=1e-5)

    print("KERNEL_OK")
</pallas_src>

<mosaic_0001>
module attributes {stable_mosaic.version = 11 : i64} {
  func.func @_mlp_kernel(%arg0: i32, %arg1: memref<8x32xf32, #tpu.memory_space<vmem>>, %arg2: memref<32x128xf32, #tpu.memory_space<vmem>>, %arg3: memref<1x128xf32, #tpu.memory_space<vmem>>, %arg4: memref<128x128xf32, #tpu.memory_space<vmem>>, %arg5: memref<1x128xf32, #tpu.memory_space<vmem>>, %arg6: memref<128x16xf32, #tpu.memory_space<vmem>>, %arg7: memref<1x16xf32, #tpu.memory_space<vmem>>, %arg8: memref<8x16xf32, #tpu.memory_space<vmem>>) attributes {dimension_semantics = [#tpu.dimension_semantics<parallel>], iteration_bounds = array<i64: 1>, scalar_prefetch = 0 : i64, scratch_operands = 0 : i64, tpu.core_type = #tpu.core_type<tc>, window_params = [{transform_indices = @transform_0, window_bounds = array<i64: 8, 32>}, {pipeline_mode = #tpu.pipeline_mode<synchronous>, transform_indices = @transform_1, window_bounds = array<i64: 32, 128>}, {pipeline_mode = #tpu.pipeline_mode<synchronous>, transform_indices = @transform_2, window_bounds = array<i64: 1, 128>}, {pipeline_mode = #tpu.pipeline_mode<synchronous>, transform_indices = @transform_3, window_bounds = array<i64: 128, 128>}, {pipeline_mode = #tpu.pipeline_mode<synchronous>, transform_indices = @transform_4, window_bounds = array<i64: 1, 128>}, {pipeline_mode = #tpu.pipeline_mode<synchronous>, transform_indices = @transform_5, window_bounds = array<i64: 128, 16>}, {pipeline_mode = #tpu.pipeline_mode<synchronous>, transform_indices = @transform_6, window_bounds = array<i64: 1, 16>}, {transform_indices = @transform_7, window_bounds = array<i64: 8, 16>}]} {
    %c0 = arith.constant 0 : index
    %c0_0 = arith.constant 0 : index
    %0 = vector.load %arg1[%c0, %c0_0] : memref<8x32xf32, #tpu.memory_space<vmem>>, vector<8x32xf32>
    %c0_1 = arith.constant 0 : index
    %c0_2 = arith.constant 0 : index
    %1 = vector.load %arg2[%c0_1, %c0_2] : memref<32x128xf32, #tpu.memory_space<vmem>>, vector<32x128xf32>
    %cst = arith.constant dense<0.000000e+00> : vector<8x128xf32>
    %2 = tpu.matmul %0, %1, %cst {dimension_numbers = #tpu.dot_dimension_numbers<[1], [0], [0], [1], [0, 0, 1, 1], [], []>} : vector<8x32xf32>, vector<32x128xf32>, vector<8x128xf32> -> vector<8x128xf32>
    %c0_3 = arith.constant 0 : index
    %c0_4 = arith.constant 0 : index
    %3 = vector.load %arg3[%c0_3, %c0_4] : memref<1x128xf32, #tpu.memory_space<vmem>>, vector<1x128xf32>
    %4 = vector.broadcast %3 : vector<1x128xf32> to vector<8x128xf32>
    %5 = arith.addf %2, %4 : vector<8x128xf32>
    %cst_5 = arith.constant 0.000000e+00 : f32
    %6 = vector.broadcast %cst_5 : f32 to vector<8x128xf32>
    %7 = arith.maximumf %5, %6 : vector<8x128xf32>
    %c0_6 = arith.constant 0 : index
    %c0_7 = arith.constant 0 : index
    %8 = vector.load %arg4[%c0_6, %c0_7] : memref<128x128xf32, #tpu.memory_space<vmem>>, vector<128x128xf32>
    %cst_8 = arith.constant dense<0.000000e+00> : vector<8x128xf32>
    %9 = tpu.matmul %7, %8, %cst_8 {dimension_numbers = #tpu.dot_dimension_numbers<[1], [0], [0], [1], [0, 0, 1, 1], [], []>} : vector<8x128xf32>, vector<128x128xf32>, vector<8x128xf32> -> vector<8x128xf32>
    %c0_9 = arith.constant 0 : index
    %c0_10 = arith.constant 0 : index
    %10 = vector.load %arg5[%c0_9, %c0_10] : memref<1x128xf32, #tpu.memory_space<vmem>>, vector<1x128xf32>
    %11 = vector.broadcast %10 : vector<1x128xf32> to vector<8x128xf32>
    %12 = arith.addf %9, %11 : vector<8x128xf32>
    %cst_11 = arith.constant 0.000000e+00 : f32
    %13 = vector.broadcast %cst_11 : f32 to vector<8x128xf32>
    %14 = arith.maximumf %12, %13 : vector<8x128xf32>
    %c0_12 = arith.constant 0 : index
    %c0_13 = arith.constant 0 : index
    %15 = vector.load %arg6[%c0_12, %c0_13] : memref<128x16xf32, #tpu.memory_space<vmem>>, vector<128x16xf32>
    %cst_14 = arith.constant dense<0.000000e+00> : vector<8x16xf32>
    %16 = tpu.matmul %14, %15, %cst_14 {dimension_numbers = #tpu.dot_dimension_numbers<[1], [0], [0], [1], [0, 0, 1, 1], [], []>} : vector<8x128xf32>, vector<128x16xf32>, vector<8x16xf32> -> vector<8x16xf32>
    %c0_15 = arith.constant 0 : index
    %c0_16 = arith.constant 0 : index
    %17 = vector.load %arg7[%c0_15, %c0_16] : memref<1x16xf32, #tpu.memory_space<vmem>>, vector<1x16xf32>
    %18 = vector.broadcast %17 : vector<1x16xf32> to vector<8x16xf32>
    %19 = arith.addf %16, %18 : vector<8x16xf32>
    %cst_17 = arith.constant 0.000000e+00 : f32
    %20 = vector.broadcast %cst_17 : f32 to vector<8x16xf32>
    %21 = arith.maximumf %19, %20 : vector<8x16xf32>
    %c0_18 = arith.constant 0 : index
    %c0_19 = arith.constant 0 : index
    %22 = vector.load %arg8[%c0_18, %c0_19] : memref<8x16xf32, #tpu.memory_space<vmem>>, vector<8x16xf32>
    tpu.vector_store %arg8[%c0_18, %c0_19], %21 {strides = array<i32>} : memref<8x16xf32, #tpu.memory_space<vmem>>, vector<8x16xf32>,
    return
  }
  func.func @transform_0(%arg0: i32) -> (i32, i32) {
    %c0_i32 = arith.constant 0 : i32
    %c0_i32_0 = arith.constant 0 : i32
    return %arg0, %c0_i32 : i32, i32
  }
  func.func @transform_1(%arg0: i32) -> (i32, i32) {
    %c0_i32 = arith.constant 0 : i32
    %c0_i32_0 = arith.constant 0 : i32
    %c0_i32_1 = arith.constant 0 : i32
    return %c0_i32, %c0_i32_0 : i32, i32
  }
  func.func @transform_2(%arg0: i32) -> (i32, i32) {
    %c0_i32 = arith.constant 0 : i32
    %c0_i32_0 = arith.constant 0 : i32
    %c0_i32_1 = arith.constant 0 : i32
    return %c0_i32, %c0_i32_0 : i32, i32
  }
  func.func @transform_3(%arg0: i32) -> (i32, i32) {
    %c0_i32 = arith.constant 0 : i32
    %c0_i32_0 = arith.constant 0 : i32
    %c0_i32_1 = arith.constant 0 : i32
    return %c0_i32, %c0_i32_0 : i32, i32
  }
  func.func @transform_4(%arg0: i32) -> (i32, i32) {
    %c0_i32 = arith.constant 0 : i32
    %c0_i32_0 = arith.constant 0 : i32
    %c0_i32_1 = arith.constant 0 : i32
    return %c0_i32, %c0_i32_0 : i32, i32
  }
  func.func @transform_5(%arg0: i32) -> (i32, i32) {
    %c0_i32 = arith.constant 0 : i32
    %c0_i32_0 = arith.constant 0 : i32
    %c0_i32_1 = arith.constant 0 : i32
    return %c0_i32, %c0_i32_0 : i32, i32
  }
  func.func @transform_6(%arg0: i32) -> (i32, i32) {
    %c0_i32 = arith.constant 0 : i32
    %c0_i32_0 = arith.constant 0 : i32
    %c0_i32_1 = arith.constant 0 : i32
    return %c0_i32, %c0_i32_0 : i32, i32
  }
  func.func @transform_7(%arg0: i32) -> (i32, i32) {
    %c0_i32 = arith.constant 0 : i32
    %c0_i32_0 = arith.constant 0 : i32
    return %arg0, %c0_i32 : i32, i32
  }
}

</mosaic_0001>

<bundles_post_ra>
// kernel: hybrid_guide_network.1
= control target key start
LH: loop header
LB: loop body
LE: loop exit
PB: predicated region body
PF: predicated region fallthrough
CT: control target
= control target key end

     0   :  { %12 = vsyncpa [#allocation3], 0  ;;  %s817_s0 = inlined_call_operand.hbm [shape: f32[8,32], index: 0, kind: input, shape index: {}]   ;;  %s818_s1 = inlined_call_operand.vmem [shape: f32[32,128], index: 1, kind: input, shape index: {}]   ;;  %s819_s2 = inlined_call_operand.vmem [shape: f32[1,128], index: 2, kind: input, shape index: {}]   ;;  %s820_s3 = inlined_call_operand.vmem [shape: f32[128,128], index: 3, kind: input, shape index: {}]   ;;  %s821_s4 = inlined_call_operand.vmem [shape: f32[1,128], index: 4, kind: input, shape index: {}]   ;;  %s822_s5 = inlined_call_operand.vmem [shape: f32[128,16], index: 5, kind: input, shape index: {}]   ;;  %s823_s6 = inlined_call_operand.hbm [shape: f32[1,16], index: 6, kind: input, shape index: {}]   ;;  %s824_s7 = inlined_call_operand.hbm [shape: f32[8,16], index: 7, kind: output, shape index: {}]  }
   0x1   :  { %13 = vsyncpa [#allocation6], 0 }
   0x2   :  { %14 = vsyncpa [#allocation4], 0  ;;  %s600_s24 = smov [#allocation2]   ;;  %s601_s26 = smov [#allocation5]  }
   0x3   :  { %s21_s25 = sshll.u32 %s600_s24, 4  ;;  %s41_s27 = sshll.u32 %s601_s26, 4  ;;  %s22_s25 = int_to_ptr.vmem [resolvable:$true] %s21_s25  ;;  %s42_s27 = int_to_ptr.vmem [resolvable:$true] %s41_s27 }
   0x4   :  { %s528_s30 = scalar_lea.hbm %s817_s0, 128 }
   0x5   :  { %p529_p0 = scmp.ne.s32.totalorder %s817_s0, %s528_s30  ;;  %p532_p1 = scmp.lt.u32.totalorder %s528_s30, %s817_s0 }
   0x7   :  { %p534_p2 = pnand %p532_p1, %p529_p0 }
   0x9   :  { %537 = shalt.err (!%p534_p2)
}
   0xa   :  { %s538_s12 = scalar_lea.vmem %s22_s25, 128  ;;  %p543_p4 = scmp.lt.s32.totalorder %s22_s25, %s22_s25 }
   0xb   :  { %p539_p3 = scmp.ne.s32.totalorder %s22_s25, %s538_s12  ;;  %p544_p5 = scmp.lt.s32.totalorder %s538_s12, %s538_s12 }
   0xd   :  { %p545_p6 = por %p544_p5, %p543_p4 }
   0xf   :  { %p546_p7 = pnand %p545_p6, %p539_p3 }
  0x11   :  { %549 = shalt.err (!%p546_p7)
}
  0x12   :  { %24 = dma.hbm_to_vmem [thread:$0]  %s817_s0, 128, %s22_s25, [#allocation3]  }
  0x13   :  { %s550_s17 = scalar_lea.hbm %s823_s6, 16 }
  0x14   :  { %p551_p8 = scmp.ne.s32.totalorder %s823_s6, %s550_s17  ;;  %p554_p9 = scmp.lt.u32.totalorder %s550_s17, %s823_s6 }
  0x16   :  { %p556_p10 = pnand %p554_p9, %p551_p8 }
  0x18   :  { %559 = shalt.err (!%p556_p10)
}
  0x19   :  { %s560_s22 = scalar_lea.vmem %s42_s27, 16  ;;  %s564_s23 = scalar_lea.vmem %s42_s27, 32 }
  0x1a   :  { %p561_p11 = scmp.ne.s32.totalorder %s42_s27, %s560_s22  ;;  %p565_p12 = scmp.lt.s32.totalorder %s42_s27, %s42_s27 }
  0x1b   :  { %p566_p13 = scmp.lt.s32.totalorder %s564_s23, %s560_s22 }
  0x1d   :  { %p567_p0 = por %p566_p13, %p565_p12 }
  0x1f   :  { %p568_p1 = pnand %p567_p0, %p561_p11 }
  0x21   :  { %571 = shalt.err (!%p568_p1)
}
  0x22   :  { %44 = dma.hbm_to_vmem [thread:$0]  %s823_s6, 16, %s42_s27, [#allocation6]  }
  0x23   :  { %594 = dma.done.wait [#allocation3], 128  }
  0x24   :  { %595 = vsyncadd [#allocation3], 4294967168 }
  0x25   :  { %596 = dma.done.wait [#allocation6], 16  }
  0x26   :  { %597 = vsyncadd [#allocation6], 4294967280  ;;  %v602_v0 = vmov 0.0|0.0   ;;  %vm603_vm0 = vmmov 0   ;;  %v604_v1 = vmov 0.0   ;;  %v52_v2 = vld [vmem:[%s818_s1] sm:$0xff] }
  0x27   :  { %468 = vmatprep.subr.bf16.mxu0 %v602_v0  ;;  %395 = vmatprep.mubr.msk.f32.mxu0 %vm603_vm0, %v604_v1  ;;  %v53_v3 = vld [vmem:[%s818_s1 + $0x8] sm:$0xff]  ;;  %v54_v4 = vld [vmem:[%s818_s1 + $0x10] sm:$0xff]  ;;  %v55_v6 = vld [vmem:[%s818_s1 + $0x18] sm:$0xff]  ;;  %vm63_vm1 = vcmask 261120   ;;  %vm326_vm2 = vcmask 130048  }
  0x28   :  { %474 = vmatprep.subr.bf16.mxu1 %v602_v0  ;;  %430 = vmatprep.mubr.msk.f32.mxu1 %vm603_vm0, %v604_v1  ;;  %v469_v5 = vpack.c.bf16 %v53_v3, %v52_v2  ;;  %v138_v7 = vld [vmem:[%s820_s3] sm:$0xff]  ;;  %v139_v8 = vld [vmem:[%s820_s3 + $0x8] sm:$0xff]  ;;  %v140_v9 = vld [vmem:[%s820_s3 + $0x10] sm:$0xff]  ;;  %v472_v11 = vpack.c.bf16 %v55_v6, %v54_v4 }
  0x29   :  { %v141_v10 = vld [vmem:[%s820_s3 + $0x18] sm:$0xff]  ;;  %v475_v12 = vpack.c.bf16 %v139_v8, %v138_v7  ;;  %v142_v14 = vld [vmem:[%s820_s3 + $0x20] sm:$0xff]  ;;  %v143_v15 = vld [vmem:[%s820_s3 + $0x28] sm:$0xff] }
  0x2a   :  { %470 = vmatpush3.bf16.msra.mxu0 %v469_v5  ;;  %v478_v13 = vpack.c.bf16 %v141_v10, %v140_v9  ;;  %v51_v16 = vld [vmem:[#allocation2] sm:$0xff]  ;;  %v481_v17 = vpack.c.bf16 %v143_v15, %v142_v14  ;;  %v144_v18 = vld [vmem:[%s820_s3 + $0x30] sm:$0xff]  ;;  %v145_v19 = vld [vmem:[%s820_s3 + $0x38] sm:$0xff] }
  0x2b   :  { %471 = vmatprep.subr.bf16.mxu0 %v602_v0  ;;  %476 = vmatpush3.bf16.msra.mxu1 %v475_v12  ;;  %v484_v20 = vpack.c.bf16 %v145_v19, %v144_v18  ;;  %v146_v21 = vld [vmem:[%s820_s3 + $0x40] sm:$0xff]  ;;  %v147_v22 = vld [vmem:[%s820_s3 + $0x48] sm:$0xff]  ;;  %v148_v24 = vld [vmem:[%s820_s3 + $0x50] sm:$0xff] }
  0x2c   :  { %477 = vmatprep.subr.bf16.mxu1 %v602_v0  ;;  %v487_v23 = vpack.c.bf16 %v147_v22, %v146_v21  ;;  %v149_v25 = vld [vmem:[%s820_s3 + $0x58] sm:$0xff]  ;;  %v150_v27 = vld [vmem:[%s820_s3 + $0x60] sm:$0xff]  ;;  %v151_v28 = vld [vmem:[%s820_s3 + $0x68] sm:$0xff] }
  0x2d   :  { %v490_v26 = vpack.c.bf16 %v149_v25, %v148_v24  ;;  %v493_v29 = vpack.c.bf16 %v151_v28, %v150_v27  ;;  %v152_v30 = vld [vmem:[%s820_s3 + $0x70] sm:$0xff]  ;;  %v153_v31 = vld [vmem:[%s820_s3 + $0x78] sm:$0xff]  ;;  %v232_v33 = vld [vmem:[%s822_s5] sm:$0xff] }
  0x2e   :  { %473 = vmatpush3.bf16.msra.mxu0 %v472_v11  ;;  %v496_v32 = vpack.c.bf16 %v153_v31, %v152_v30  ;;  %v233_v34 = vld [vmem:[%s822_s5 + $0x8] sm:$0xff]  ;;  %v234_v35 = vld [vmem:[%s822_s5 + $0x10] sm:$0xff]  ;;  %v235_v37 = vld [vmem:[%s822_s5 + $0x18] sm:$0xff] }
  0x2f   :  { %498 = vmatprep.subr.bf16.mxu0 %v602_v0  ;;  %479 = vmatpush3.bf16.msra.mxu1 %v478_v13  ;;  %v499_v36 = vpack.c.bf16 %v233_v34, %v232_v33  ;;  %v502_v38 = vpack.c.bf16 %v235_v37, %v234_v35  ;;  %v236_v39 = vld [vmem:[%s822_s5 + $0x20] sm:$0xff]  ;;  %v237_v40 = vld [vmem:[%s822_s5 + $0x28] sm:$0xff]  ;;  %v238_v42 = vld [vmem:[%s822_s5 + $0x30] sm:$0xff] }
  0x30   :  { %480 = vmatprep.subr.bf16.mxu1 %v602_v0  ;;  %v505_v41 = vpack.c.bf16 %v237_v40, %v236_v39  ;;  %v239_v43 = vld [vmem:[%s822_s5 + $0x38] sm:$0xff]  ;;  %v240_v45 = vld [vmem:[%s822_s5 + $0x40] sm:$0xff]  ;;  %v241_v46 = vld [vmem:[%s822_s5 + $0x48] sm:$0xff] }
  0x31   :  { %396 = vmatmul.mubr.msk.f32.vlgmr.msra.gmra.mrb[0].mxu0 %vm63_vm1, %v51_v16  ;;  %v508_v44 = vpack.c.bf16 %v239_v43, %v238_v42  ;;  %v511_v47 = vpack.c.bf16 %v241_v46, %v240_v45  ;;  %v242_v48 = vld [vmem:[%s822_s5 + $0x50] sm:$0xff]  ;;  %v243_v49 = vld [vmem:[%s822_s5 + $0x58] sm:$0xff]  ;;  %v244_v51 = vld [vmem:[%s822_s5 + $0x60] sm:$0xff] }
  0x32   :  { %465 = vmatprep.mubr.msk.f32.mxu0 %vm603_vm0, %v604_v1  ;;  %500 = vmatpush3.bf16.msra.mxu0 %v499_v36  ;;  %v514_v50 = vpack.c.bf16 %v243_v49, %v242_v48  ;;  %v245_v52 = vld [vmem:[%s822_s5 + $0x68] sm:$0xff]  ;;  %v344_v54 = vld [vmem:[%s819_s2] ss:$0 sm:$0xff]  ;;  %v246_v59 = vld [vmem:[%s822_s5 + $0x70] sm:$0xff]  ;;  %s605_s2 = smov [#allocation7]  }
  0x33   :  { %482 = vmatpush3.bf16.msra.mxu1 %v481_v17  ;;  %501 = vmatprep.subr.bf16.mxu0 %v602_v0  ;;  %v517_v53 = vpack.c.bf16 %v245_v52, %v244_v51  ;;  %v247_v60 = vld [vmem:[%s822_s5 + $0x78] sm:$0xff]  ;;  %v346_v62 = vld [vmem:[%s821_s4] ss:$0 sm:$0xff]  ;;  %v347_v3 = vld [vmem:[#allocation5] ss:$0 sm:$0xff]  ;;  %s334_s22 = sshll.u32 %s605_s2, 4  ;;  %s335_s22 = int_to_ptr.vmem [resolvable:$true] %s334_s22 }
  0x34   :  { %483 = vmatprep.subr.bf16.mxu1 %v602_v0  ;;  %v520_v61 = vpack.c.bf16 %v247_v60, %v246_v59  ;;  %s572_s5 = scalar_lea.vmem %s335_s22, 128  ;;  %p577_p3 = scmp.lt.s32.totalorder %s335_s22, %s335_s22 }
  0x35   :  { %p573_p2 = scmp.ne.s32.totalorder %s335_s22, %s572_s5  ;;  %p578_p4 = scmp.lt.s32.totalorder %s572_s5, %s572_s5 }
  0x36   :  { %503 = vmatpush3.bf16.msra.mxu0 %v502_v38 }
  0x37   :  { %485 = vmatpush3.bf16.msra.mxu1 %v484_v20  ;;  %504 = vmatprep.subr.bf16.mxu0 %v602_v0  ;;  %p579_p5 = por %p578_p4, %p577_p3 }
  0x38   :  { %486 = vmatprep.subr.bf16.mxu1 %v602_v0 }
  0x39   :  { %p580_p6 = pnand %p579_p5, %p573_p2 }
  0x3a   :  { %506 = vmatpush3.bf16.msra.mxu0 %v505_v41 }
  0x3b   :  { %488 = vmatpush3.bf16.msra.mxu1 %v487_v23  ;;  %507 = vmatprep.subr.bf16.mxu0 %v602_v0 }
  0x3c   :  { %489 = vmatprep.subr.bf16.mxu1 %v602_v0 }
  0x3e   :  { %509 = vmatpush3.bf16.msra.mxu0 %v508_v44 }
  0x3f   :  { %491 = vmatpush3.bf16.msra.mxu1 %v490_v26  ;;  %510 = vmatprep.subr.bf16.mxu0 %v602_v0 }
  0x40   :  { %492 = vmatprep.subr.bf16.mxu1 %v602_v0 }
  0x42   :  { %512 = vmatpush3.bf16.msra.mxu0 %v511_v47 }
  0x43   :  { %494 = vmatpush3.bf16.msra.mxu1 %v493_v29  ;;  %513 = vmatprep.subr.bf16.mxu0 %v602_v0 }
  0x44   :  { %495 = vmatprep.subr.bf16.mxu1 %v602_v0 }
  0x46   :  { %515 = vmatpush3.bf16.msra.mxu0 %v514_v50 }
  0x47   :  { %497 = vmatpush3.bf16.msra.mxu1 %v496_v32  ;;  %516 = vmatprep.subr.bf16.mxu0 %v602_v0 }
  0x4a   :  { %518 = vmatpush3.bf16.msra.mxu0 %v517_v53 }
  0x4b   :  { %519 = vmatprep.subr.bf16.mxu0 %v602_v0 }
  0x4e   :  { %521 = vmatpush3.bf16.msra.mxu0 %v520_v61 }
 0x104   :  { %v133_v55 = vpop.f32.mrb[0].mxu0 }
 0x105   :  { %v134_v56 = vadd.f32 %v344_v54, %v133_v55  ;;  %v397_v57 = vpop.f32.mrb[1].mxu0 }
 0x107   :  { %v137_v58 = vmax.f32 %v134_v56, 0.0 }
 0x109   :  { %431 = vmatmul.mubr.f32.vlgmr.msra.gmra.mrb[0].mxu1 %v137_v58 }
 0x1dc   :  { %v227_v63 = vpop.f32.mrb[0].mxu1 }
 0x1dd   :  { %v228_v0 = vadd.f32 %v346_v62, %v227_v63  ;;  %v432_v1 = vpop.f32.mrb[1].mxu1 }
 0x1df   :  { %v231_v2 = vmax.f32 %v228_v0, 0.0 }
 0x1e1   :  { %466 = vmatmul.mubr.f32.vlgmr.msra.gmra.mrb[2].mxu0 %v231_v2 }
 0x2b4   :  { %v321_v4 = vpop.f32.mrb[2].mxu0 }
 0x2b5   :  { %v322_v5 = vadd.f32 %v347_v3, %v321_v4  ;;  %v467_v6 = vpop.f32.mrb[3].mxu0 }
 0x2b7   :  { %v325_v7 = vmax.f32 %v322_v5, 0.0 }
 0x2b9   :  { %327 = vst.msk [vmem:[#allocation7] sm:$0xff] %vm326_vm2, %v325_v7 }
 0x2ba   :  { %583 = shalt.err (!%p580_p6)
}
 0x2bb   :  { %s584_s0 = scalar_lea.hbm %s824_s7, 128 }
 0x2bc   :  { %p585_p7 = scmp.ne.s32.totalorder %s824_s7, %s584_s0  ;;  %p588_p8 = scmp.lt.u32.totalorder %s584_s0, %s824_s7 }
 0x2be   :  { %p590_p9 = pnand %p588_p8, %p585_p7 }
 0x2c0   :  { %593 = shalt.err (!%p590_p9)
}
 0x2c1   :  { %337 = dma.vmem_to_hbm [thread:$0]  %s335_s22, 128, %s824_s7, [#allocation4]  }
 0x2c2   :  { %598 = dma.done.wait [#allocation4], 128  }
 0x2c3   :  { %599 = vsyncadd [#allocation4], 4294967168 }
 0x2c4   :  { %341 = vsyncpa [#allocation3], 1 }
 0x2c5   :  { %342 = vsyncpa [#allocation6], 1 }
 0x2c6   :  { %343 = vsyncpa [#allocation4], 1 }

</bundles_post_ra>
